<compile_context>
chip_gen: v5e
topology: v5e:2x2
jax: 0.10.0
libtpu: 0.0.40
codegen_flags: <defaults>
</compile_context>

<pallas_src>
import jax
import jax.numpy as jnp
from jax.experimental import pallas as pl
from jax.experimental.pallas import tpu as pltpu

LANE = 128
SUBLANE = 8


def _round_up(x, m):
    return (x + m - 1) // m * m


def dnn_kernel(x_ref, w1_ref, b1_ref, w2_ref, b2_ref, o_ref):
    # fcn1 + ReLU: bf16 operands on the MXU, f32 accumulation, f32 epilogue.
    h = jnp.dot(x_ref[...], w1_ref[...], preferred_element_type=jnp.float32)
    h = jnp.maximum(h + b1_ref[...], 0.0)       # b1 is (1, n_enc_p), broadcasts
    # fcn2 + ReLU: feed the hidden back through the MXU in the weight dtype.
    z = jnp.dot(h.astype(w2_ref.dtype), w2_ref[...],
                preferred_element_type=jnp.float32)
    z = jnp.maximum(z + b2_ref[...], 0.0)       # b2 is (1, n_z_p)
    o_ref[...] = z.astype(o_ref.dtype)


def dnn_forward(x, w1, b1, w2, b2, *, block_b=512, use_bf16=True):
    """Pallas implementation of DNN.forward (dropout p=0.0 == identity).

    # TODO(synk): stochastic dropout (p > 0, training=True) would need
    # pltpu.prng_seed / pltpu.prng_random_bits; not required for p=0.0.
    """
    B, n_input = x.shape
    n_enc = w1.shape[1]
    n_z = w2.shape[1]
    out_dtype = x.dtype

    # Pad feature dims to 128 lanes. Zero padding is exact: padded x cols /
    # w rows contribute 0 to the dot, padded bias entries are 0, ReLU(0)=0,
    # and padded output columns are sliced off below.
    n_input_p = _round_up(n_input, LANE)
    n_enc_p = _round_up(n_enc, LANE)
    n_z_p = _round_up(n_z, LANE)

    # Batch tile: multiple of 8 sublanes, capped at block_b. At block_b=512
    # the pipelined VMEM footprint (2 x/out buffers + resident weights) is
    # well under 1 MiB, far inside v7x's 64 MiB physical / 32 MiB scoped VMEM.
    tb = _round_up(min(block_b, _round_up(B, SUBLANE)), SUBLANE)
    b_pad = _round_up(B, tb)
    grid_b = b_pad // tb

    mm_dtype = jnp.bfloat16 if use_bf16 else x.dtype

    # Wrapper-side padding + bf16 cast of the matmul operands (halves DMA).
    x_p = jnp.zeros((b_pad, n_input_p), mm_dtype).at[:B, :n_input].set(
        x.astype(mm_dtype))
    w1_p = jnp.zeros((n_input_p, n_enc_p), mm_dtype).at[:n_input, :n_enc].set(
        w1.astype(mm_dtype))
    w2_p = jnp.zeros((n_enc_p, n_z_p), mm_dtype).at[:n_enc, :n_z].set(
        w2.astype(mm_dtype))
    # Biases stay f32 (epilogue runs in f32 on the VPU, incl. v5e).
    b1_p = jnp.zeros((1, n_enc_p), jnp.float32).at[0, :n_enc].set(
        b1.astype(jnp.float32))
    b2_p = jnp.zeros((1, n_z_p), jnp.float32).at[0, :n_z].set(
        b2.astype(jnp.float32))

    mm_bytes = jnp.dtype(mm_dtype).itemsize
    out_bytes = jnp.dtype(out_dtype).itemsize
    cost = pl.CostEstimate(
        flops=2 * B * (n_input * n_enc + n_enc * n_z),
        transcendentals=0,
        bytes_accessed=(x_p.size * mm_bytes + w1_p.size * mm_bytes
                        + w2_p.size * mm_bytes + b1_p.size * 4 + b2_p.size * 4
                        + b_pad * n_z_p * out_bytes),
    )

    out_p = pl.pallas_call(
        dnn_kernel,
        out_shape=jax.ShapeDtypeStruct((b_pad, n_z_p), out_dtype),
        grid=(grid_b,),
        in_specs=[
            pl.BlockSpec((tb, n_input_p), lambda i: (i, 0)),        # tiled x
            pl.BlockSpec((n_input_p, n_enc_p), lambda i: (0, 0)),   # resident
            pl.BlockSpec((1, n_enc_p), lambda i: (0, 0)),           # resident
            pl.BlockSpec((n_enc_p, n_z_p), lambda i: (0, 0)),       # resident
            pl.BlockSpec((1, n_z_p), lambda i: (0, 0)),             # resident
        ],
        out_specs=pl.BlockSpec((tb, n_z_p), lambda i: (i, 0)),
        compiler_params=pltpu.CompilerParams(
            # Batch axis is independent -> parallel shards across v7x's
            # 2 TensorCores; neutral on single-TC v5e/v6e.
            dimension_semantics=("parallel",),
            vmem_limit_bytes=32 * 1024 * 1024,
        ),
        cost_estimate=cost,
    )(x_p, w1_p, b1_p, w2_p, b2_p)

    return out_p[:B, :n_z]


def reference_forward_f32(x, w1, b1, w2, b2):
    h = jnp.maximum(x @ w1 + b1, 0.0)
    return jnp.maximum(h @ w2 + b2, 0.0)


def reference_forward_bf16(x, w1, b1, w2, b2):
    # Mirrors the kernel's numerics: bf16 operands, f32 accumulation,
    # f32 bias + ReLU epilogue.
    bf = jnp.bfloat16
    h = jnp.dot(x.astype(bf), w1.astype(bf), preferred_element_type=jnp.float32)
    h = jnp.maximum(h + b1, 0.0)
    z = jnp.dot(h.astype(bf), w2.astype(bf), preferred_element_type=jnp.float32)
    return jnp.maximum(z + b2, 0.0)


if __name__ == "__main__":
    # DNN(n_enc=64, n_input=32, n_z=16), batch=8, dropout=0.0 (identity).
    B, n_input, n_enc, n_z = 8, 32, 64, 16

    key = jax.random.PRNGKey(0)
    kx, kw1, kb1, kw2, kb2 = jax.random.split(key, 5)

    x = jax.random.normal(kx, (B, n_input), dtype=jnp.float32)
    # Weights stored as (in, out) — the transpose of PyTorch's (out, in).
    w1 = jax.random.uniform(kw1, (n_input, n_enc), dtype=jnp.float32,
                            minval=-1.0, maxval=1.0) / jnp.sqrt(n_input)
    b1 = jax.random.uniform(kb1, (n_enc,), dtype=jnp.float32,
                            minval=-1.0, maxval=1.0) / jnp.sqrt(n_input)
    w2 = jax.random.uniform(kw2, (n_enc, n_z), dtype=jnp.float32,
                            minval=-1.0, maxval=1.0) / jnp.sqrt(n_enc)
    b2 = jax.random.uniform(kb2, (n_z,), dtype=jnp.float32,
                            minval=-1.0, maxval=1.0) / jnp.sqrt(n_enc)

    out = dnn_forward(x, w1, b1, w2, b2)
    out = jax.block_until_ready(out)
    assert out.shape == (B, n_z)

    # Tight check against a reference with identical bf16/f32 numerics.
    ref_bf16 = reference_forward_bf16(x, w1, b1, w2, b2)
    assert jnp.allclose(out, ref_bf16, atol=2e-3, rtol=2e-3), \
        "mismatch vs bf16-matched reference"
    # Loose sanity check against the pure-f32 reference (bf16 operand error).
    ref_f32 = reference_forward_f32(x, w1, b1, w2, b2)
    assert jnp.allclose(out, ref_f32, atol=5e-2, rtol=5e-2), \
        "mismatch vs f32 reference"

    print("KERNEL_OK")
</pallas_src>

<mosaic_0001>
module attributes {stable_mosaic.version = 11 : i64} {
  func.func @dnn_kernel(%arg0: i32, %arg1: memref<8x128xbf16, #tpu.memory_space<vmem>>, %arg2: memref<128x128xbf16, #tpu.memory_space<vmem>>, %arg3: memref<1x128xf32, #tpu.memory_space<vmem>>, %arg4: memref<128x128xbf16, #tpu.memory_space<vmem>>, %arg5: memref<1x128xf32, #tpu.memory_space<vmem>>, %arg6: memref<8x128xf32, #tpu.memory_space<vmem>>) attributes {dimension_semantics = [#tpu.dimension_semantics<parallel>], iteration_bounds = array<i64: 1>, scalar_prefetch = 0 : i64, scratch_operands = 0 : i64, tpu.core_type = #tpu.core_type<tc>, window_params = [{transform_indices = @transform_0, window_bounds = array<i64: 8, 128>}, {pipeline_mode = #tpu.pipeline_mode<synchronous>, transform_indices = @transform_1, window_bounds = array<i64: 128, 128>}, {pipeline_mode = #tpu.pipeline_mode<synchronous>, transform_indices = @transform_2, window_bounds = array<i64: 1, 128>}, {pipeline_mode = #tpu.pipeline_mode<synchronous>, transform_indices = @transform_3, window_bounds = array<i64: 128, 128>}, {pipeline_mode = #tpu.pipeline_mode<synchronous>, transform_indices = @transform_4, window_bounds = array<i64: 1, 128>}, {transform_indices = @transform_5, window_bounds = array<i64: 8, 128>}]} {
    %c0 = arith.constant 0 : index
    %c0_0 = arith.constant 0 : index
    %0 = vector.load %arg1[%c0, %c0_0] : memref<8x128xbf16, #tpu.memory_space<vmem>>, vector<8x128xbf16>
    %c0_1 = arith.constant 0 : index
    %c0_2 = arith.constant 0 : index
    %1 = vector.load %arg2[%c0_1, %c0_2] : memref<128x128xbf16, #tpu.memory_space<vmem>>, vector<128x128xbf16>
    %cst = arith.constant dense<0.000000e+00> : vector<8x128xf32>
    %2 = tpu.matmul %0, %1, %cst {dimension_numbers = #tpu.dot_dimension_numbers<[1], [0], [0], [1], [0, 0, 1, 1], [], []>} : vector<8x128xbf16>, vector<128x128xbf16>, vector<8x128xf32> -> vector<8x128xf32>
    %c0_3 = arith.constant 0 : index
    %c0_4 = arith.constant 0 : index
    %3 = vector.load %arg3[%c0_3, %c0_4] : memref<1x128xf32, #tpu.memory_space<vmem>>, vector<1x128xf32>
    %4 = vector.broadcast %3 : vector<1x128xf32> to vector<8x128xf32>
    %5 = arith.addf %2, %4 : vector<8x128xf32>
    %cst_5 = arith.constant 0.000000e+00 : f32
    %6 = vector.broadcast %cst_5 : f32 to vector<8x128xf32>
    %7 = arith.maximumf %5, %6 : vector<8x128xf32>
    %8 = arith.truncf %7 : vector<8x128xf32> to vector<8x128xbf16>
    %c0_6 = arith.constant 0 : index
    %c0_7 = arith.constant 0 : index
    %9 = vector.load %arg4[%c0_6, %c0_7] : memref<128x128xbf16, #tpu.memory_space<vmem>>, vector<128x128xbf16>
    %cst_8 = arith.constant dense<0.000000e+00> : vector<8x128xf32>
    %10 = tpu.matmul %8, %9, %cst_8 {dimension_numbers = #tpu.dot_dimension_numbers<[1], [0], [0], [1], [0, 0, 1, 1], [], []>} : vector<8x128xbf16>, vector<128x128xbf16>, vector<8x128xf32> -> vector<8x128xf32>
    %c0_9 = arith.constant 0 : index
    %c0_10 = arith.constant 0 : index
    %11 = vector.load %arg5[%c0_9, %c0_10] : memref<1x128xf32, #tpu.memory_space<vmem>>, vector<1x128xf32>
    %12 = vector.broadcast %11 : vector<1x128xf32> to vector<8x128xf32>
    %13 = arith.addf %10, %12 : vector<8x128xf32>
    %cst_11 = arith.constant 0.000000e+00 : f32
    %14 = vector.broadcast %cst_11 : f32 to vector<8x128xf32>
    %15 = arith.maximumf %13, %14 : vector<8x128xf32>
    %c0_12 = arith.constant 0 : index
    %c0_13 = arith.constant 0 : index
    %16 = vector.load %arg6[%c0_12, %c0_13] : memref<8x128xf32, #tpu.memory_space<vmem>>, vector<8x128xf32>
    tpu.vector_store %arg6[%c0_12, %c0_13], %15 {strides = array<i32>} : memref<8x128xf32, #tpu.memory_space<vmem>>, vector<8x128xf32>,
    return
  }
  func.func @transform_0(%arg0: i32) -> (i32, i32) {
    %c0_i32 = arith.constant 0 : i32
    %c0_i32_0 = arith.constant 0 : i32
    return %arg0, %c0_i32 : i32, i32
  }
  func.func @transform_1(%arg0: i32) -> (i32, i32) {
    %c0_i32 = arith.constant 0 : i32
    %c0_i32_0 = arith.constant 0 : i32
    %c0_i32_1 = arith.constant 0 : i32
    return %c0_i32, %c0_i32_0 : i32, i32
  }
  func.func @transform_2(%arg0: i32) -> (i32, i32) {
    %c0_i32 = arith.constant 0 : i32
    %c0_i32_0 = arith.constant 0 : i32
    %c0_i32_1 = arith.constant 0 : i32
    return %c0_i32, %c0_i32_0 : i32, i32
  }
  func.func @transform_3(%arg0: i32) -> (i32, i32) {
    %c0_i32 = arith.constant 0 : i32
    %c0_i32_0 = arith.constant 0 : i32
    %c0_i32_1 = arith.constant 0 : i32
    return %c0_i32, %c0_i32_0 : i32, i32
  }
  func.func @transform_4(%arg0: i32) -> (i32, i32) {
    %c0_i32 = arith.constant 0 : i32
    %c0_i32_0 = arith.constant 0 : i32
    %c0_i32_1 = arith.constant 0 : i32
    return %c0_i32, %c0_i32_0 : i32, i32
  }
  func.func @transform_5(%arg0: i32) -> (i32, i32) {
    %c0_i32 = arith.constant 0 : i32
    %c0_i32_0 = arith.constant 0 : i32
    return %arg0, %c0_i32 : i32, i32
  }
}

</mosaic_0001>

<bundles_post_ra>
// kernel: tpu_custom_call.1
= control target key start
LH: loop header
LB: loop body
LE: loop exit
PB: predicated region body
PF: predicated region fallthrough
CT: control target
= control target key end

     0   :  { %10 = vsyncpa [#allocation3], 0  ;;  %s495_s0 = inlined_call_operand.hbm [shape: bf16[8,128], index: 0, kind: input, shape index: {}]   ;;  %s496_s1 = inlined_call_operand.hbm [shape: bf16[128,128], index: 1, kind: input, shape index: {}]   ;;  %s497_s2 = inlined_call_operand.vmem [shape: f32[1,128], index: 2, kind: input, shape index: {}]   ;;  %s498_s3 = inlined_call_operand.hbm [shape: bf16[128,128], index: 3, kind: input, shape index: {}]   ;;  %s499_s4 = inlined_call_operand.vmem [shape: f32[1,128], index: 4, kind: input, shape index: {}]   ;;  %s500_s5 = inlined_call_operand.hbm [shape: f32[8,128], index: 5, kind: output, shape index: {}]  }
   0x1   :  { %11 = vsyncpa [#allocation6], 0  ;;  %s28_s20 = sshll.u32 %s496_s1, 4  ;;  %s29_s20 = int_to_ptr.hbm [resolvable:$true] %s28_s20 }
   0x2   :  { %12 = vsyncpa [#allocation4], 0  ;;  %s441_s21 = smov [#allocation5]   ;;  %s18_s25 = sshll.u32 %s495_s0, 4  ;;  %s19_s25 = int_to_ptr.hbm [resolvable:$true] %s18_s25 }
   0x3   :  { %s30_s22 = sshll.u32 %s441_s21, 4  ;;  %s442_s26 = smov 64   ;;  %s31_s22 = int_to_ptr.vmem [resolvable:$true] %s30_s22 }
   0x4   :  { %s443_s27 = smov 4   ;;  %s444_s28 = smov [#allocation2]  }
   0x5   :  { %36 = dma.hbm_to_vmem [thread:$0]  %s29_s20, 1024, %s31_s22, [#allocation6], %s442_s26, %s442_s26, %s443_s27  }
   0x6   :  { %s20_s29 = sshll.u32 %s444_s28, 4  ;;  %s43_s7 = sshll.u32 %s498_s3, 4  ;;  %s21_s29 = int_to_ptr.vmem [resolvable:$true] %s20_s29  ;;  %s44_s7 = int_to_ptr.hbm [resolvable:$true] %s43_s7 }
   0x7   :  { %23 = dma.hbm_to_vmem [thread:$0]  %s19_s25, 64, %s21_s29, [#allocation3]  }
   0x8   :  { %s445_s1 = smov [#allocation7]  }
   0x9   :  { %s45_s8 = sshll.u32 %s445_s1, 4  ;;  %s46_s8 = int_to_ptr.vmem [resolvable:$true] %s45_s8 }
   0xa   :  { %51 = dma.hbm_to_vmem [thread:$0]  %s44_s7, 1024, %s46_s8, [#allocation6], %s442_s26, %s442_s26, %s443_s27  }
   0xb   :  { %435 = dma.done.wait [#allocation3], 64  }
   0xc   :  { %436 = vsyncadd [#allocation3], 4294967232 }
   0xd   :  { %437 = dma.done.wait [#allocation6], 2048  }
   0xe   :  { %438 = vsyncadd [#allocation6], 4294965248  ;;  %v322_v0 = vld [vmem:[#allocation5 + $0x38] sm:$0xff]  ;;  %v321_v1 = vld [vmem:[#allocation5 + $0x30] sm:$0xff]  ;;  %s446_s11 = smov [#allocation8]   ;;  %s240_s15 = sshll.u32 %s500_s5, 4  ;;  %s241_s15 = int_to_ptr.hbm [resolvable:$true] %s240_s15 }
   0xf   :  { %135 = vmatpush.bf16.msra.mxu0 %v322_v0  ;;  %v330_v2 = vld [vmem:[#allocation7 + $0x38] sm:$0xff]  ;;  %v329_v3 = vld [vmem:[#allocation7 + $0x30] sm:$0xff]  ;;  %v320_v4 = vld [vmem:[#allocation5 + $0x28] sm:$0xff]  ;;  %s238_s12 = sshll.u32 %s446_s11, 4  ;;  %s239_s12 = int_to_ptr.vmem [resolvable:$true] %s238_s12 }
  0x10   :  { %218 = vmatpush.bf16.msra.mxu1 %v330_v2  ;;  %v328_v5 = vld [vmem:[#allocation7 + $0x28] sm:$0xff]  ;;  %v319_v6 = vld [vmem:[#allocation5 + $0x20] sm:$0xff]  ;;  %v318_v8 = vld [vmem:[#allocation5 + $0x18] sm:$0xff] }
  0x11   :  { %v327_v7 = vld [vmem:[#allocation7 + $0x20] sm:$0xff]  ;;  %v326_v9 = vld [vmem:[#allocation7 + $0x18] sm:$0xff]  ;;  %v317_v10 = vld [vmem:[#allocation5 + $0x10] sm:$0xff] }
  0x12   :  { %v325_v11 = vld [vmem:[#allocation7 + $0x10] sm:$0xff]  ;;  %v316_v12 = vld [vmem:[#allocation5 + $0x8] sm:$0xff]  ;;  %v315_v13 = vld [vmem:[#allocation5] sm:$0xff] }
  0x13   :  { %136 = vmatpush.bf16.msra.mxu0 %v321_v1  ;;  %v66_v14 = vld [vmem:[#allocation2] sm:$0xf]  ;;  %v324_v15 = vld [vmem:[#allocation7 + $0x8] sm:$0xff]  ;;  %v323_v16 = vld [vmem:[#allocation7] sm:$0xff] }
  0x14   :  { %219 = vmatpush.bf16.msra.mxu1 %v329_v3  ;;  %v337_v17 = vld [vmem:[%s497_s2] ss:$0 sm:$0xff] }
  0x15   :  { %v338_v23 = vld [vmem:[%s499_s4] ss:$0 sm:$0xff] }
  0x17   :  { %137 = vmatpush.bf16.msra.mxu0 %v320_v4 }
  0x18   :  { %220 = vmatpush.bf16.msra.mxu1 %v328_v5 }
  0x1b   :  { %138 = vmatpush.bf16.msra.mxu0 %v319_v6 }
  0x1c   :  { %221 = vmatpush.bf16.msra.mxu1 %v327_v7 }
  0x1f   :  { %139 = vmatpush.bf16.msra.mxu0 %v318_v8 }
  0x20   :  { %222 = vmatpush.bf16.msra.mxu1 %v326_v9 }
  0x23   :  { %140 = vmatpush.bf16.msra.mxu0 %v317_v10 }
  0x24   :  { %223 = vmatpush.bf16.msra.mxu1 %v325_v11 }
  0x27   :  { %141 = vmatpush.bf16.msra.mxu0 %v316_v12 }
  0x28   :  { %224 = vmatpush.bf16.msra.mxu1 %v324_v15 }
  0x2b   :  { %142 = vmatpush.bf16.msra.mxu0 %v315_v13 }
  0x2c   :  { %225 = vmatpush.bf16.msra.mxu1 %v323_v16 }
  0x2e   :  { %143 = vmatmul.bf16.vlgmr.msra.gmra.mxu0 %v66_v14 }
  0xab   :  { %v144_v18 = vpop.f32.mrf.mxu0 }
  0xac   :  { %v145_v19 = vadd.f32 %v337_v17, %v144_v18 }
  0xae   :  { %v148_v20 = vmax.f32 %v145_v19, 0.0 }
  0xb0   :  { %v149_v21 = vpack.c.bf16 %v148_v20, %v148_v20 }
  0xb2   :  { %226 = vmatmul.bf16.vlgmr.msra.gmra.mxu1 %v149_v21 }
  0xb3   :  { %v146_v22 = vpop.f32.mrf.mxu0 }
 0x12f   :  { %v227_v24 = vpop.f32.mrf.mxu1 }
 0x130   :  { %v228_v25 = vadd.f32 %v338_v23, %v227_v24 }
 0x132   :  { %v231_v26 = vmax.f32 %v228_v25, 0.0 }
 0x134   :  { %232 = vst [vmem:[#allocation8] sm:$0xff] %v231_v26 }
 0x135   :  { %243 = dma.vmem_to_hbm [thread:$0]  %s239_s12, 128, %s241_s15, [#allocation4]  }
 0x137   :  { %v229_v27 = vpop.f32.mrf.mxu1 }
 0x138   :  { %439 = dma.done.wait [#allocation4], 128  }
 0x139   :  { %440 = vsyncadd [#allocation4], 4294967168 }
 0x13a   :  { %248 = vsyncpa [#allocation3], 1 }
 0x13b   :  { %249 = vsyncpa [#allocation6], 1 }
 0x13c   :  { %250 = vsyncpa [#allocation4], 1 }

</bundles_post_ra>
